<compile_context>
chip_gen: v6e
topology: v6e:2x2x1
jax: 0.10.0
libtpu: 0.0.40
codegen_flags: <defaults>
</compile_context>

<pallas_src>
import functools
import math

import jax
import jax.numpy as jnp
import numpy as np
from jax.experimental import pallas as pl
from jax.experimental.pallas import tpu as pltpu

_VMEM_LIMIT = 64 * 1024 * 1024


def _round_up(x, m):
    return (x + m - 1) // m * m


def _pad_rows(x, mult):
    n = x.shape[0]
    pad = (-n) % mult
    if pad:
        x = jnp.pad(x, ((0, pad), (0, 0)))
    return x


# ----------------------------- Pallas kernels ------------------------------

def _matmul_split_kernel(x_ref, w_ref, b_ref, *out_refs, splits, relu, use_bf16):
    """One row-tile of  y = x @ W + b  (optionally relu), split column-wise into outputs."""
    x = x_ref[...]
    w = w_ref[...]
    if use_bf16:
        x = x.astype(jnp.bfloat16)
        w = w.astype(jnp.bfloat16)
    y = jnp.dot(x, w, preferred_element_type=jnp.float32) + b_ref[...]
    if relu:
        y = jnp.maximum(y, 0.0)
    off = 0
    for ref, width in zip(out_refs, splits):
        ref[...] = y[:, off:off + width].astype(ref.dtype)
        off += width


def pallas_fused_linear(x, w, b, splits, *, relu=False, use_bf16=False, row_tile=256):
    """x: [N, Din] @ w: [Din, sum(splits)] + b, outputs split column-wise. Rows are tiled
    (default 256) and padded to a multiple of the tile."""
    n0, din = x.shape
    dout = w.shape[1]
    assert sum(splits) == dout
    tile = min(row_tile, _round_up(n0, 8))
    xp = _pad_rows(x, tile)
    n = xp.shape[0]
    out_shape = tuple(jax.ShapeDtypeStruct((n, s), jnp.float32) for s in splits)
    out_specs = tuple(pl.BlockSpec((tile, s), lambda i: (i, 0)) for s in splits)
    outs = pl.pallas_call(
        functools.partial(_matmul_split_kernel, splits=splits, relu=relu, use_bf16=use_bf16),
        out_shape=out_shape,
        grid=(n // tile,),
        in_specs=[
            pl.BlockSpec((tile, din), lambda i: (i, 0)),
            pl.BlockSpec((din, dout), lambda i: (0, 0)),
            pl.BlockSpec((1, dout), lambda i: (0, 0)),
        ],
        out_specs=out_specs,
        compiler_params=pltpu.CompilerParams(
            dimension_semantics=("parallel",), vmem_limit_bytes=_VMEM_LIMIT),
    )(xp, w, b.reshape(1, dout))
    if not isinstance(outs, (list, tuple)):
        outs = (outs,)
    return tuple(o[:n0] for o in outs)


def _rel_attn_kernel(q_ref, k_ref, v_ref, qvr_ref, cst_ref, pe_ref, pfw_ref, pfb_ref,
                     bias_ref, o_ref, m_sc, l_sc, acc_sc, *, nh, d, use_bf16, h_chunk):
    """Flash-style relative attention over one (batch, q-tile, kv-tile) block, all heads.

    The RelPositionFusion linear (relu(pe @ Wpf + bpf)) is fused here: the (tq, tk, H)
    relative-position block is produced on the fly in VMEM (chunked over H) and never
    written to HBM.  qvr_ref holds (Q + v) projected through W_r (weight-folded in the
    wrapper, score scale included), so
        B.D[i,j,h] = qvr[i,h,:] . relu_pos[i,j,:] + cst[i,h]
    which is computed on the MXU as one batched matmul over the query index for all heads.
    q_ref already has +u and the score scale folded into the projection, so A_C = q . k^T.
    """
    mxu = jnp.bfloat16 if use_bf16 else jnp.float32
    ki = pl.program_id(2)

    @pl.when(ki == 0)
    def _init():
        m_sc[...] = jnp.full_like(m_sc, -1e30)
        l_sc[...] = jnp.zeros_like(l_sc)
        acc_sc[...] = jnp.zeros_like(acc_sc)

    q = q_ref[...]          # (tq, H)  f32, scale & +u folded
    k = k_ref[...]          # (tk, H)
    v = v_ref[...]          # (tk, H)
    cst = cst_ref[...]      # (tq, nh)
    bias = bias_ref[...]    # (1, tk)  f32 mask bias
    qvr = qvr_ref[...]      # (tq, nh, H)

    tq, H = q.shape
    tk = k.shape[0]
    pin = pe_ref.shape[-1]

    qm = q.astype(mxu)
    km = k.astype(mxu)
    vm = v.astype(mxu)

    # --- fused RelPositionFusion + B.D, chunked over the hidden dim ---
    pe2 = pe_ref[...].reshape(tq * tk, pin).astype(mxu)     # (tq*tk, pin)
    bd_all = None
    for c0 in range(0, H, h_chunk):
        csl = slice(c0, c0 + h_chunk)
        pos_c = jnp.dot(pe2, pfw_ref[:, csl].astype(mxu),
                        preferred_element_type=jnp.float32) + pfb_ref[:, csl]
        pos_c = jnp.maximum(pos_c, 0.0).reshape(tq, tk, h_chunk)          # relu_pos chunk
        term = jnp.einsum("qnh,qkh->qnk", qvr[:, :, csl].astype(mxu),
                          pos_c.astype(mxu), preferred_element_type=jnp.float32)
        bd_all = term if bd_all is None else bd_all + term                # (tq, nh, tk)

    for h in range(nh):
        sl = slice(h * d, (h + 1) * d)
        ac = jnp.dot(qm[:, sl], km[:, sl].T, preferred_element_type=jnp.float32)  # (tq, tk)
        s = ac + bd_all[:, h, :] + cst[:, h:h + 1] + bias                          # f32

        m_prev = m_sc[h]                                              # (tq, 1)
        m_new = jnp.maximum(m_prev, jnp.max(s, axis=-1, keepdims=True))
        alpha = jnp.exp(m_prev - m_new)
        p = jnp.exp(s - m_new)                                        # (tq, tk) f32
        l_sc[h] = alpha * l_sc[h] + jnp.sum(p, axis=-1, keepdims=True)
        pv = jnp.dot(p.astype(mxu), vm[:, sl], preferred_element_type=jnp.float32)  # (tq, d)
        acc_sc[h] = alpha * acc_sc[h] + pv
        m_sc[h] = m_new

    @pl.when(ki == pl.num_programs(2) - 1)
    def _finalize():
        for h in range(nh):
            sl = slice(h * d, (h + 1) * d)
            inv = pl.reciprocal(l_sc[h], approx=True)                 # (tq, 1)
            o_ref[:, sl] = (acc_sc[h] * inv).astype(o_ref.dtype)


def pallas_rel_attention(q, k, v, qvr, cst, pe4, pf_w, pf_b, bias, *, nh, tq, tk,
                         use_bf16=False):
    """q/k/v: [B,L,H]; qvr: [B,L,nh,H]; cst: [B,L,nh]; pe4: [B,L,L,P];
    pf_w: [P,H]; pf_b: [H]; bias: [B,1,L].  Returns [B, L, H] (lane-dense)."""
    B, L, H = q.shape
    d = H // nh
    P = pe4.shape[-1]
    assert L % tq == 0 and L % tk == 0
    # chunk the fused pos-fusion over the hidden dim to bound the (tq, tk, hc) intermediate
    if H > 256 and H % 256 == 0:
        h_chunk = 256
    elif H > 256 and H % 128 == 0:
        h_chunk = 128
    else:
        h_chunk = H
    grid = (B, L // tq, L // tk)
    kernel = functools.partial(_rel_attn_kernel, nh=nh, d=d, use_bf16=use_bf16,
                               h_chunk=h_chunk)
    return pl.pallas_call(
        kernel,
        out_shape=jax.ShapeDtypeStruct((B, L, H), jnp.float32),
        grid=grid,
        in_specs=[
            pl.BlockSpec((None, tq, H), lambda b, qi, ki: (b, qi, 0)),          # q (scaled,+u)
            pl.BlockSpec((None, tk, H), lambda b, qi, ki: (b, ki, 0)),          # k
            pl.BlockSpec((None, tk, H), lambda b, qi, ki: (b, ki, 0)),          # v
            pl.BlockSpec((None, tq, nh, H), lambda b, qi, ki: (b, qi, 0, 0)),   # qvr
            pl.BlockSpec((None, tq, nh), lambda b, qi, ki: (b, qi, 0)),         # cst
            pl.BlockSpec((None, tq, tk, P), lambda b, qi, ki: (b, qi, ki, 0)),  # pe4 (raw pos)
            pl.BlockSpec((P, H), lambda b, qi, ki: (0, 0)),                     # pos-fusion W
            pl.BlockSpec((1, H), lambda b, qi, ki: (0, 0)),                     # pos-fusion b
            pl.BlockSpec((None, 1, tk), lambda b, qi, ki: (b, 0, ki)),          # mask bias
        ],
        out_specs=pl.BlockSpec((None, tq, H), lambda b, qi, ki: (b, qi, 0)),
        scratch_shapes=[
            pltpu.VMEM((nh, tq, 1), jnp.float32),   # running max per head
            pltpu.VMEM((nh, tq, 1), jnp.float32),   # running sum per head
            pltpu.VMEM((nh, tq, d), jnp.float32),   # running accumulator per head
        ],
        compiler_params=pltpu.CompilerParams(
            dimension_semantics=("parallel", "parallel", "arbitrary"),
            vmem_limit_bytes=_VMEM_LIMIT),
    )(q, k, v, qvr, cst, pe4, pf_w, pf_b.reshape(1, H), bias)


def _self_output_kernel(x_ref, res_ref, w_ref, b_ref, g_ref, be_ref, o_ref, *, eps, use_bf16):
    x = x_ref[...]
    w = w_ref[...]
    if use_bf16:
        x = x.astype(jnp.bfloat16)
        w = w.astype(jnp.bfloat16)
    h = jnp.dot(x, w, preferred_element_type=jnp.float32) + b_ref[...] + res_ref[...]
    mu = jnp.mean(h, axis=-1, keepdims=True)
    var = jnp.mean((h - mu) ** 2, axis=-1, keepdims=True)
    o_ref[...] = ((h - mu) * jax.lax.rsqrt(var + eps) * g_ref[...] + be_ref[...]
                  ).astype(o_ref.dtype)


def pallas_self_output(x, residual, w, b, gamma, beta, eps, *, use_bf16=False, row_tile=256):
    """BertSelfOutput: LayerNorm(x @ w + b + residual). x/residual: [N, H]."""
    n0, h = x.shape
    tile = min(row_tile, _round_up(n0, 8))
    xp = _pad_rows(x, tile)
    rp = _pad_rows(residual, tile)
    n = xp.shape[0]
    out = pl.pallas_call(
        functools.partial(_self_output_kernel, eps=eps, use_bf16=use_bf16),
        out_shape=jax.ShapeDtypeStruct((n, h), jnp.float32),
        grid=(n // tile,),
        in_specs=[
            pl.BlockSpec((tile, h), lambda i: (i, 0)),
            pl.BlockSpec((tile, h), lambda i: (i, 0)),
            pl.BlockSpec((h, h), lambda i: (0, 0)),
            pl.BlockSpec((1, h), lambda i: (0, 0)),
            pl.BlockSpec((1, h), lambda i: (0, 0)),
            pl.BlockSpec((1, h), lambda i: (0, 0)),
        ],
        out_specs=pl.BlockSpec((tile, h), lambda i: (i, 0)),
        compiler_params=pltpu.CompilerParams(
            dimension_semantics=("parallel",), vmem_limit_bytes=_VMEM_LIMIT),
    )(xp, rp, w, b.reshape(1, h), gamma.reshape(1, h), beta.reshape(1, h))
    return out[:n0]


# ------------------------------- module glue --------------------------------

def init_params(key, cfg):
    H = cfg["hidden_size"]
    nh = cfg["num_heads"]
    d = H // nh
    pin = cfg["dim_pos"] * cfg["num_pos"]

    def lin(k, din, dout):
        kw, kb = jax.random.split(k)
        return (jax.random.normal(kw, (din, dout), jnp.float32) * 0.05,
                jax.random.normal(kb, (dout,), jnp.float32) * 0.05)

    ks = jax.random.split(key, 8)
    p = {}
    p["pf_w"], p["pf_b"] = lin(ks[0], pin, H)        # RelPositionFusion.pos_fusion_forward
    p["wq_w"], p["wq_b"] = lin(ks[1], H, H)
    p["wk_w"], p["wk_b"] = lin(ks[2], H, H)
    p["wv_w"], p["wv_b"] = lin(ks[3], H, H)
    p["wr_w"], p["wr_b"] = lin(ks[4], H, H)
    p["u"] = jax.random.normal(ks[5], (nh, d), jnp.float32) * 0.05
    p["v"] = jax.random.normal(ks[6], (nh, d), jnp.float32) * 0.05
    p["out_w"], p["out_b"] = lin(ks[7], H, H)        # BertSelfOutput.dense
    p["ln_g"] = jnp.ones((H,), jnp.float32)
    p["ln_b"] = jnp.zeros((H,), jnp.float32)
    return p


def transf_self_encoder_rel(hidden, pos_list, seq_mask, params, cfg, *,
                            use_bf16=False, row_tile=256, q_tile=128, kv_tile=128):
    B, L, H = hidden.shape
    nh = cfg["num_heads"]
    d = H // nh
    scale = 1.0 / math.sqrt(d) if cfg["scaled"] else 1.0
    tq = min(q_tile, L)
    tk = min(kv_tile, L)

    # ---- weight preprocessing (pure parameter folding, done once) ----
    wq, bq = params["wq_w"], params["wq_b"]
    wr, br = params["wr_w"], params["wr_b"]
    upar, vpar = params["u"], params["v"]                # (nh, d) each
    wq_h = wq.reshape(H, nh, d)                          # wq[:, h*d+d'] = wq_h[:, h, d']
    wr_h = wr.reshape(H, nh, d)
    bq_h = bq.reshape(nh, d)
    br_h = br.reshape(nh, d)

    # q columns are only used for the A_C term -> fold +u and the 1/sqrt(d) scale in.
    wq_attn = wq * scale
    bq_attn = (bq + upar.reshape(H)) * scale
    # Wcomb[p, h*H + c] = sum_d' Wq[p, h*d+d'] * Wr[c, h*d+d']   (= Wq_h @ Wr_h^T per head)
    wcomb = (jnp.einsum("phd,chd->hpc", wq_h, wr_h).transpose(1, 0, 2)
             .reshape(H, nh * H) * scale)
    bcomb = jnp.einsum("hd,chd->hc", bq_h + vpar, wr_h).reshape(nh * H) * scale
    # constant term qv . b_r per head, folded as extra output columns
    wcst = jnp.einsum("phd,hd->ph", wq_h, br_h) * scale          # (H, nh)
    bcst = jnp.sum((bq_h + vpar) * br_h, axis=-1) * scale        # (nh,)

    w_all = jnp.concatenate([wq_attn, params["wk_w"], params["wv_w"], wcomb, wcst], axis=1)
    b_all = jnp.concatenate([bq_attn, params["wk_b"], params["wv_b"], bcomb, bcst], axis=0)

    # ---- fused projection: q | k | v | (q+v)@W_r^T per head | (q+v).b_r per head ----
    x_flat = hidden.reshape(B * L, H)
    splits = (H, H, H, nh * H, nh)
    q2, k2, v2, qvr2, cst2 = pallas_fused_linear(
        x_flat, w_all, b_all, splits, relu=False, use_bf16=use_bf16, row_tile=row_tile)
    q = q2.reshape(B, L, H)
    k = k2.reshape(B, L, H)
    v = v2.reshape(B, L, H)
    qvr = qvr2.reshape(B, L, nh, H)
    cst = cst2.reshape(B, L, nh)

    # ---- raw relative-position features (pos fusion itself is fused into attention) ----
    pe4 = jnp.concatenate(pos_list, axis=-1)                       # [B, L, L, pin]
    bias = jnp.where(seq_mask > 0, 0.0, -1e15).astype(jnp.float32).reshape(B, 1, L)

    # ---- flash-style relative attention with fused pos-fusion (lane-dense [B,L,H] out) ----
    attn_vec = pallas_rel_attention(q, k, v, qvr, cst, pe4, params["pf_w"], params["pf_b"],
                                    bias, nh=nh, tq=tq, tk=tk, use_bf16=use_bf16)

    # ---- BertSelfOutput: LayerNorm(dense(attn_vec) + hidden) ----
    out = pallas_self_output(attn_vec.reshape(B * L, H), x_flat,
                             params["out_w"], params["out_b"],
                             params["ln_g"], params["ln_b"], cfg["layer_norm_eps"],
                             use_bf16=use_bf16, row_tile=row_tile)
    # TODO(synk): config.en_ffd=False (TransfFFD not defined in the reference source); skipped.
    return out.reshape(B, L, H)


# ------------------------- pure-JAX reference check -------------------------

def reference(hidden, pos_list, seq_mask, params, cfg):
    B, L, H = hidden.shape
    nh = cfg["num_heads"]
    d = H // nh
    scale = 1.0 / math.sqrt(d) if cfg["scaled"] else 1.0

    pe4 = jnp.concatenate(pos_list, axis=-1)
    rel_pos = jax.nn.relu(pe4 @ params["pf_w"] + params["pf_b"])      # [B, L, L, H]

    q = hidden @ params["wq_w"] + params["wq_b"]
    k = hidden @ params["wk_w"] + params["wk_b"]
    v = hidden @ params["wv_w"] + params["wv_b"]
    r = rel_pos @ params["wr_w"] + params["wr_b"]

    q = q.reshape(B, L, nh, d).transpose(0, 2, 1, 3)
    k = k.reshape(B, L, nh, d).transpose(0, 2, 1, 3)
    v = v.reshape(B, L, nh, d).transpose(0, 2, 1, 3)
    rel = r.reshape(B, L, L, nh, d).transpose(0, 3, 1, 2, 4)

    qu = q + params["u"][None, :, None, :]
    qv = q + params["v"][None, :, None, :]
    ac = jnp.einsum("bhid,bhjd->bhij", qu, k)
    bd = jnp.einsum("bhid,bhijd->bhij", qv, rel)
    bias = jnp.where(seq_mask > 0, 0.0, -1e15)[:, None, None, :]
    score = (ac + bd) * scale + bias
    p = jax.nn.softmax(score, axis=-1)
    attn = jnp.einsum("bhij,bhjd->bhid", p, v)
    attn_vec = attn.transpose(0, 2, 1, 3).reshape(B, L, H)

    h = attn_vec @ params["out_w"] + params["out_b"] + hidden
    mu = h.mean(-1, keepdims=True)
    var = ((h - mu) ** 2).mean(-1, keepdims=True)
    return (h - mu) / jnp.sqrt(var + cfg["layer_norm_eps"]) * params["ln_g"] + params["ln_b"]


# ----------------------------------- main ------------------------------------

if __name__ == "__main__":
    cfg = dict(hidden_size=32, num_heads=4, dim_pos=8, num_pos=4,
               scaled=True, attn_dropout=0.0, hidden_dropout=0.0,
               layer_norm_eps=1e-12, en_ffd=False)

    B, L, H = 2, 8, cfg["hidden_size"]

    key = jax.random.PRNGKey(0)
    k_par, k_hid, k_pos, k_msk = jax.random.split(key, 4)
    params = init_params(k_par, cfg)

    hidden = jax.random.normal(k_hid, (B, L, H), jnp.float32)
    pos_keys = jax.random.split(k_pos, cfg["num_pos"])
    pos_list = [jax.random.normal(pk, (B, L, L, cfg["dim_pos"]), jnp.float32)
                for pk in pos_keys]
    # seq_mask: 1 for valid tokens (second example has 2 padded positions)
    seq_mask = jnp.array([[1] * L, [1] * (L - 2) + [0, 0]], dtype=jnp.int32)

    ref = reference(hidden, pos_list, seq_mask, params, cfg)

    # f32 path (tolerance covers approx reciprocal + weight-folded matmul reassociation)
    out = transf_self_encoder_rel(hidden, pos_list, seq_mask, params, cfg, use_bf16=False)
    out = jax.block_until_ready(out)
    np.testing.assert_allclose(np.asarray(out), np.asarray(ref), rtol=5e-3, atol=5e-3)

    # bf16 MXU-operand path (softmax / mask / LayerNorm stay f32)
    out_bf16 = transf_self_encoder_rel(hidden, pos_list, seq_mask, params, cfg, use_bf16=True)
    out_bf16 = jax.block_until_ready(out_bf16)
    np.testing.assert_allclose(np.asarray(out_bf16), np.asarray(ref), rtol=6e-2, atol=6e-2)

    print("KERNEL_OK")
</pallas_src>

<mosaic_0001>
module attributes {stable_mosaic.version = 11 : i64} {
  func.func @_matmul_split_kernel(%arg0: i32, %arg1: memref<16x32xf32, #tpu.memory_space<vmem>>, %arg2: memref<32x228xf32, #tpu.memory_space<vmem>>, %arg3: memref<1x228xf32, #tpu.memory_space<vmem>>, %arg4: memref<16x32xf32, #tpu.memory_space<vmem>>, %arg5: memref<16x32xf32, #tpu.memory_space<vmem>>, %arg6: memref<16x32xf32, #tpu.memory_space<vmem>>, %arg7: memref<16x128xf32, #tpu.memory_space<vmem>>, %arg8: memref<16x4xf32, #tpu.memory_space<vmem>>) attributes {dimension_semantics = [#tpu.dimension_semantics<parallel>], iteration_bounds = array<i64: 1>, scalar_prefetch = 0 : i64, scratch_operands = 0 : i64, tpu.core_type = #tpu.core_type<tc>, window_params = [{transform_indices = @transform_0, window_bounds = array<i64: 16, 32>}, {pipeline_mode = #tpu.pipeline_mode<synchronous>, transform_indices = @transform_1, window_bounds = array<i64: 32, 228>}, {pipeline_mode = #tpu.pipeline_mode<synchronous>, transform_indices = @transform_2, window_bounds = array<i64: 1, 228>}, {transform_indices = @transform_3, window_bounds = array<i64: 16, 32>}, {transform_indices = @transform_4, window_bounds = array<i64: 16, 32>}, {transform_indices = @transform_5, window_bounds = array<i64: 16, 32>}, {transform_indices = @transform_6, window_bounds = array<i64: 16, 128>}, {transform_indices = @transform_7, window_bounds = array<i64: 16, 4>}]} {
    %c0 = arith.constant 0 : index
    %c0_0 = arith.constant 0 : index
    %0 = vector.load %arg1[%c0, %c0_0] : memref<16x32xf32, #tpu.memory_space<vmem>>, vector<16x32xf32>
    %c0_1 = arith.constant 0 : index
    %c0_2 = arith.constant 0 : index
    %1 = vector.load %arg2[%c0_1, %c0_2] : memref<32x228xf32, #tpu.memory_space<vmem>>, vector<32x228xf32>
    %cst = arith.constant dense<0.000000e+00> : vector<16x228xf32>
    %2 = tpu.matmul %0, %1, %cst {dimension_numbers = #tpu.dot_dimension_numbers<[1], [0], [0], [1], [0, 0, 1, 1], [], []>} : vector<16x32xf32>, vector<32x228xf32>, vector<16x228xf32> -> vector<16x228xf32>
    %c0_3 = arith.constant 0 : index
    %c0_4 = arith.constant 0 : index
    %3 = vector.load %arg3[%c0_3, %c0_4] : memref<1x228xf32, #tpu.memory_space<vmem>>, vector<1x228xf32>
    %4 = vector.broadcast %3 : vector<1x228xf32> to vector<16x228xf32>
    %5 = arith.addf %2, %4 : vector<16x228xf32>
    %6 = vector.extract_strided_slice %5 {offsets = [0, 0], sizes = [16, 32], strides = [1, 1]} : vector<16x228xf32> to vector<16x32xf32>
    %c0_5 = arith.constant 0 : index
    %c0_6 = arith.constant 0 : index
    %7 = vector.load %arg4[%c0_5, %c0_6] : memref<16x32xf32, #tpu.memory_space<vmem>>, vector<16x32xf32>
    tpu.vector_store %arg4[%c0_5, %c0_6], %6 {strides = array<i32>} : memref<16x32xf32, #tpu.memory_space<vmem>>, vector<16x32xf32>,
    %8 = vector.extract_strided_slice %5 {offsets = [0, 32], sizes = [16, 32], strides = [1, 1]} : vector<16x228xf32> to vector<16x32xf32>
    %c0_7 = arith.constant 0 : index
    %c0_8 = arith.constant 0 : index
    %9 = vector.load %arg5[%c0_7, %c0_8] : memref<16x32xf32, #tpu.memory_space<vmem>>, vector<16x32xf32>
    tpu.vector_store %arg5[%c0_7, %c0_8], %8 {strides = array<i32>} : memref<16x32xf32, #tpu.memory_space<vmem>>, vector<16x32xf32>,
    %10 = vector.extract_strided_slice %5 {offsets = [0, 64], sizes = [16, 32], strides = [1, 1]} : vector<16x228xf32> to vector<16x32xf32>
    %c0_9 = arith.constant 0 : index
    %c0_10 = arith.constant 0 : index
    %11 = vector.load %arg6[%c0_9, %c0_10] : memref<16x32xf32, #tpu.memory_space<vmem>>, vector<16x32xf32>
    tpu.vector_store %arg6[%c0_9, %c0_10], %10 {strides = array<i32>} : memref<16x32xf32, #tpu.memory_space<vmem>>, vector<16x32xf32>,
    %12 = vector.extract_strided_slice %5 {offsets = [0, 96], sizes = [16, 128], strides = [1, 1]} : vector<16x228xf32> to vector<16x128xf32>
    %c0_11 = arith.constant 0 : index
    %c0_12 = arith.constant 0 : index
    %13 = vector.load %arg7[%c0_11, %c0_12] : memref<16x128xf32, #tpu.memory_space<vmem>>, vector<16x128xf32>
    tpu.vector_store %arg7[%c0_11, %c0_12], %12 {strides = array<i32>} : memref<16x128xf32, #tpu.memory_space<vmem>>, vector<16x128xf32>,
    %14 = vector.extract_strided_slice %5 {offsets = [0, 224], sizes = [16, 4], strides = [1, 1]} : vector<16x228xf32> to vector<16x4xf32>
    %c0_13 = arith.constant 0 : index
    %c0_14 = arith.constant 0 : index
    %15 = vector.load %arg8[%c0_13, %c0_14] : memref<16x4xf32, #tpu.memory_space<vmem>>, vector<16x4xf32>
    tpu.vector_store %arg8[%c0_13, %c0_14], %14 {strides = array<i32>} : memref<16x4xf32, #tpu.memory_space<vmem>>, vector<16x4xf32>,
    return
  }
  func.func @transform_0(%arg0: i32) -> (i32, i32) {
    %c0_i32 = arith.constant 0 : i32
    %c0_i32_0 = arith.constant 0 : i32
    return %arg0, %c0_i32 : i32, i32
  }
  func.func @transform_1(%arg0: i32) -> (i32, i32) {
    %c0_i32 = arith.constant 0 : i32
    %c0_i32_0 = arith.constant 0 : i32
    %c0_i32_1 = arith.constant 0 : i32
    return %c0_i32, %c0_i32_0 : i32, i32
  }
  func.func @transform_2(%arg0: i32) -> (i32, i32) {
    %c0_i32 = arith.constant 0 : i32
    %c0_i32_0 = arith.constant 0 : i32
    %c0_i32_1 = arith.constant 0 : i32
    return %c0_i32, %c0_i32_0 : i32, i32
  }
  func.func @transform_3(%arg0: i32) -> (i32, i32) {
    %c0_i32 = arith.constant 0 : i32
    %c0_i32_0 = arith.constant 0 : i32
    return %arg0, %c0_i32 : i32, i32
  }
  func.func @transform_4(%arg0: i32) -> (i32, i32) {
    %c0_i32 = arith.constant 0 : i32
    %c0_i32_0 = arith.constant 0 : i32
    return %arg0, %c0_i32 : i32, i32
  }
  func.func @transform_5(%arg0: i32) -> (i32, i32) {
    %c0_i32 = arith.constant 0 : i32
    %c0_i32_0 = arith.constant 0 : i32
    return %arg0, %c0_i32 : i32, i32
  }
  func.func @transform_6(%arg0: i32) -> (i32, i32) {
    %c0_i32 = arith.constant 0 : i32
    %c0_i32_0 = arith.constant 0 : i32
    return %arg0, %c0_i32 : i32, i32
  }
  func.func @transform_7(%arg0: i32) -> (i32, i32) {
    %c0_i32 = arith.constant 0 : i32
    %c0_i32_0 = arith.constant 0 : i32
    return %arg0, %c0_i32 : i32, i32
  }
}

</mosaic_0001>

<bundles_post_ra>
// kernel: tpu_custom_call.1
= control target key start
LH: loop header
LB: loop body
LE: loop exit
PB: predicated region body
PF: predicated region fallthrough
CT: control target
= control target key end

     0   :  { %13 = vsyncpa [#allocation3], 0  ;;  %s528_s0 = inlined_call_operand.hbm [shape: f32[16,32], index: 0, kind: input, shape index: {}]   ;;  %s529_s1 = inlined_call_operand.hbm [shape: f32[32,228], index: 1, kind: input, shape index: {}]   ;;  %s530_s2 = inlined_call_operand.vmem [shape: f32[1,228], index: 2, kind: input, shape index: {}]   ;;  %s531_s3 = inlined_call_operand.hbm [shape: f32[16,32], index: 3, kind: output, shape index: {0}]   ;;  %s532_s4 = inlined_call_operand.hbm [shape: f32[16,32], index: 4, kind: output, shape index: {1}]   ;;  %s533_s5 = inlined_call_operand.hbm [shape: f32[16,32], index: 5, kind: output, shape index: {2}]   ;;  %s534_s6 = inlined_call_operand.hbm [shape: f32[16,128], index: 6, kind: output, shape index: {3}]   ;;  %s535_s7 = inlined_call_operand.vmem [shape: f32[16,4], index: 7, kind: output, shape index: {4}]  }
   0x1   :  { %14 = vsyncpa [#allocation6], 0 }
   0x2   :  { %15 = vsyncpa [#allocation4], 0 }
   0x3   :  { %16 = vsyncpa [#allocation9], 0 }
   0x4   :  { %17 = vsyncpa [#allocation12], 0  ;;  %s420_s24 = smov [#allocation2]  }
   0x5   :  { %s23_s25 = sshll.u32 %s420_s24, 4  ;;  %s24_s25 = int_to_ptr.vmem [resolvable:$true] %s23_s25 }
   0x6   :  { %s298_s26 = scalar_lea.vmem %s24_s25, 256  ;;  %p303_p1 = scmp.lt.s32.totalorder %s24_s25, %s24_s25 }
   0x7   :  { %p299_p0 = scmp.ne.s32.totalorder %s24_s25, %s298_s26  ;;  %p304_p2 = scmp.lt.s32.totalorder %s298_s26, %s298_s26 }
   0x9   :  { %p305_p3 = por %p304_p2, %p303_p1 }
   0xb   :  { %p306_p4 = pnand %p305_p3, %p299_p0 }
   0xd   :  { %309 = shalt.err (!%p306_p4)
}
   0xe   :  { %s421_s27 = smov 128   ;;  %s422_s28 = smov 8  }
   0xf   :  { %29 = dma.hbm_to_vmem [thread:$0]  %s528_s0, 256, %s24_s25, [#allocation3], %s421_s27, %s421_s27, %s422_s28  }
  0x10   :  { %s423_s8 = smov [#allocation5]  }
  0x11   :  { %s35_s9 = sshll.u32 %s423_s8, 4  ;;  %s36_s9 = int_to_ptr.vmem [resolvable:$true] %s35_s9 }
  0x12   :  { %s318_s10 = scalar_lea.vmem %s36_s9, 1024  ;;  %p323_p6 = scmp.lt.s32.totalorder %s36_s9, %s36_s9 }
  0x13   :  { %p319_p5 = scmp.ne.s32.totalorder %s36_s9, %s318_s10  ;;  %p324_p7 = scmp.lt.s32.totalorder %s318_s10, %s318_s10 }
  0x15   :  { %p325_p8 = por %p324_p7, %p323_p6 }
  0x17   :  { %p326_p9 = pnand %p325_p8, %p319_p5 }
  0x19   :  { %329 = shalt.err (!%p326_p9)
}
  0x1a   :  { %s424_s11 = smov 256   ;;  %s425_s12 = smov 16  }
  0x1b   :  { %41 = dma.hbm_to_vmem [thread:$0]  %s529_s1, 1024, %s36_s9, [#allocation6], %s424_s11, %s424_s11, %s425_s12  }
  0x1c   :  { %410 = dma.done.wait [#allocation3], 256  }
  0x1d   :  { %411 = vsyncadd [#allocation3], 4294967040 }
  0x1e   :  { %412 = dma.done.wait [#allocation6], 1024  }
  0x1f   :  { %413 = vsyncadd [#allocation6], 4294966272  ;;  %v426_v0 = vmov 0.0   ;;  %v59_v1 = vld [vmem:[#allocation5 + $0x38] sm:$0xff]  ;;  %v58_v2 = vld [vmem:[#allocation5 + $0x30] sm:$0xff]  ;;  %vm72_vm0 = vcmask 261120   ;;  %v62_v11 = vlaneseq }
  0x20   :  { %143 = vmatprep.mubr.f32.mxu0 %v426_v0  ;;  %149 = vmatprep.mubr.f32.mxu1 %v426_v0  ;;  %v57_v3 = vld [vmem:[#allocation5 + $0x28] sm:$0xff]  ;;  %v56_v4 = vld [vmem:[#allocation5 + $0x20] sm:$0xff]  ;;  %v55_v5 = vld [vmem:[#allocation5 + $0x18] sm:$0xff]  ;;  %s427_s15 = smov [#allocation7]   ;;  %s428_s17 = smov 32  }
  0x21   :  { %103 = vmatprep.subr.mxu0 %v59_v1  ;;  %268 = vmatprep.subr.mxu1 %v59_v1  ;;  %v54_v6 = vld [vmem:[#allocation5 + $0x10] sm:$0xff]  ;;  %v53_v7 = vld [vmem:[#allocation5 + $0x8] sm:$0xff]  ;;  %v52_v8 = vld [vmem:[#allocation5] sm:$0xff]  ;;  %v63_v12 = vshrl.u32 %v62_v11, 7  ;;  %s202_s16 = sshll.u32 %s427_s15, 4  ;;  %s429_s18 = smov 96   ;;  %s203_s16 = int_to_ptr.vmem [resolvable:$true] %s202_s16 }
  0x22   :  { %104 = vmatpush1.msra.mxu0 %v58_v2  ;;  %272 = vmatpush1.msra.mxu1 %v58_v2  ;;  %v50_v9 = vld [vmem:[#allocation2] sm:$0xff]  ;;  %v51_v10 = vld [vmem:[#allocation2 + $0x8] sm:$0xff]  ;;  %p335_p11 = scmp.lt.s32.totalorder %s203_s16, %s203_s16 }
  0x23   :  { %105 = vmatprep.subr.mxu0 %v57_v3  ;;  %269 = vmatprep.subr.mxu1 %v57_v3  ;;  %v64_v13 = vsub.s32 0, %v63_v12  ;;  %v60_v14 = vld [vmem:[%s530_s2] sm:$0x3]  ;;  %v68_v16 = vsub.s32 1, %v63_v12  ;;  %s330_s2 = scalar_lea.vmem %s203_s16, 256 }
  0x24   :  { %106 = vmatpush1.msra.mxu0 %v56_v4  ;;  %273 = vmatpush1.msra.mxu1 %v56_v4  ;;  %p331_p10 = scmp.ne.s32.totalorder %s203_s16, %s330_s2  ;;  %p336_p12 = scmp.lt.s32.totalorder %s330_s2, %s330_s2 }
  0x25   :  { %107 = vmatprep.subr.mxu0 %v55_v5  ;;  %270 = vmatprep.subr.mxu1 %v55_v5  ;;  %v65_v15 = vrot.slane %v60_v14, %v64_v13  ;;  %v69_v20 = vrot.slane %v60_v14, %v68_v16 }
  0x26   :  { %108 = vmatpush1.msra.mxu0 %v54_v6  ;;  %274 = vmatpush1.msra.mxu1 %v54_v6  ;;  %p337_p13 = por %p336_p12, %p335_p11 }
  0x27   :  { %109 = vmatprep.subr.mxu0 %v53_v7  ;;  %271 = vmatprep.subr.mxu1 %v53_v7 }
  0x28   :  { %110 = vmatpush1.msra.mxu0 %v52_v8  ;;  %275 = vmatpush1.msra.mxu1 %v52_v8  ;;  %p338_p0 = pnand %p337_p13, %p331_p10 }
  0x29   :  { %266 = vmatmul.mubr.msk.f32.vlgmr.msra.gmra.mxu0 %vm72_vm0, %v50_v9  ;;  %267 = vmatmul.mubr.msk.f32.vlgmr.msra.gmra.mxu1 %vm72_vm0, %v51_v10 }
  0xe9   :  { %v145_v17 = vpop.f32.mrf.mxu0  ;;  %v151_v18 = vpop.f32.mrf.mxu1 }
  0xea   :  { %v146_v19 = vadd.f32 %v145_v17, %v65_v15  ;;  %v152_v21 = vadd.f32 %v151_v18, %v65_v15 }
  0xeb   :  { %v147_v22 = vpop.f32.mrf.mxu0 }
  0xec   :  { %156 = vst.msk [vmem:[#allocation7] sm:$0xff] %vm72_vm0, %v146_v19  ;;  %157 = vst.msk [vmem:[#allocation7 + $0x8] sm:$0xff] %vm72_vm0, %v152_v21  ;;  %178 = vrot.lane.b32.xlu1 %v146_v19, %s428_s17  ;;  %160 = vrot.lane.b32.xlu0 %v146_v19, %s429_s18 }
  0xed   :  { %341 = shalt.err (!%p338_p0)
}
  0xee   :  { %208 = dma.vmem_to_hbm [thread:$0]  %s203_s16, 256, %s531_s3, [#allocation4], %s421_s27, %s421_s27, %s422_s28   ;;  %v148_v23 = vadd.f32 %v147_v22, %v69_v20  ;;  %v153_v24 = vpop.f32.mrf.mxu1  ;;  %vm194_vm1 = vcmask 31744  }
  0xef   :  { %v154_v25 = vadd.f32 %v153_v24, %v69_v20  ;;  %s430_s21 = smov 64   ;;  %s431_s22 = smov [#allocation8]  }
  0xf0   :  { %180 = vrot.lane.b32.xlu1 %v148_v23, %s428_s17  ;;  %162 = vrot.lane.b32.xlu0 %v152_v21, %s429_s18  ;;  %s214_s23 = sshll.u32 %s431_s22, 4  ;;  %s432_s25 = smov [#allocation11]   ;;  %s215_s23 = int_to_ptr.vmem [resolvable:$true] %s214_s23 }
  0xf1   :  { %s238_s26 = sshll.u32 %s432_s25, 4  ;;  %s350_s29 = scalar_lea.vmem %s215_s23, 256  ;;  %s239_s26 = int_to_ptr.vmem [resolvable:$true] %s238_s26 }
  0xf2   :  { %p351_p1 = scmp.ne.s32.totalorder %s215_s23, %s350_s29  ;;  %p355_p2 = scmp.lt.s32.totalorder %s215_s23, %s215_s23 }
  0xf3   :  { %p356_p3 = scmp.lt.s32.totalorder %s350_s29, %s350_s29 }
  0xf4   :  { %184 = vrot.lane.b32.xlu1 %v154_v25, %s428_s17  ;;  %182 = vrot.lane.b32.xlu0 %v152_v21, %s428_s17 }
  0xf5   :  { %p357_p4 = por %p356_p3, %p355_p2 }
  0xf7   :  { %p358_p5 = pnand %p357_p4, %p351_p1 }
  0xf8   :  { %170 = vrot.lane.b32.xlu1 %v152_v21, %s430_s21  ;;  %168 = vrot.lane.b32.xlu0 %v146_v19, %s430_s21 }
 0x15e   :  { %v179_v26 = vpop.permute.xlu1 %178  ;;  %v161_v27 = vpop.permute.xlu0 %160 }
 0x15f   :  { %166 = vst.msk [vmem:[#allocation8] sm:$0xff] %vm72_vm0, %v161_v27 }
 0x162   :  { %v181_v28 = vpop.permute.xlu1 %180  ;;  %v163_v29 = vpop.permute.xlu0 %162 }
 0x163   :  { %v186_v30 = vsel %vm72_vm0, %v179_v26, %v181_v28  ;;  %195 = vst.msk [vmem:[%s535_s7] sm:$0xff] %vm194_vm1, %v181_v28 }
 0x164   :  { %167 = vst.msk [vmem:[#allocation8 + $0x8] sm:$0xff] %vm72_vm0, %v163_v29  ;;  %190 = vst [vmem:[#allocation11] sm:$0xff] %v186_v30 }
 0x165   :  { %361 = shalt.err (!%p358_p5)
}
 0x166   :  { %220 = dma.vmem_to_hbm [thread:$0]  %s215_s23, 256, %s532_s4, [#allocation9], %s421_s27, %s421_s27, %s422_s28   ;;  %v185_v31 = vpop.permute.xlu1 %184  ;;  %v183_v32 = vpop.permute.xlu0 %182 }
 0x167   :  { %s433_s9 = smov [#allocation10]   ;;  %196 = vst.msk [vmem:[%s535_s7 + $0x8] sm:$0xff] %vm194_vm1, %v185_v31  ;;  %v187_v33 = vsel %vm72_vm0, %v183_v32, %v185_v31  ;;  %s370_s13 = scalar_lea.vmem %s239_s26, 256 }
 0x168   :  { %s226_s10 = sshll.u32 %s433_s9, 4  ;;  %191 = vst [vmem:[#allocation11 + $0x8] sm:$0xff] %v187_v33  ;;  %p371_p6 = scmp.ne.s32.totalorder %s239_s26, %s370_s13  ;;  %s227_s10 = int_to_ptr.vmem [resolvable:$true] %s226_s10 }
 0x169   :  { %p375_p7 = scmp.lt.s32.totalorder %s239_s26, %s239_s26  ;;  %p376_p8 = scmp.lt.s32.totalorder %s370_s13, %s370_s13 }
 0x16b   :  { %p377_p9 = por %p376_p8, %p375_p7 }
 0x16d   :  { %p378_p10 = pnand %p377_p9, %p371_p6 }
 0x16f   :  { %381 = shalt.err (!%p378_p10)
}
 0x170   :  { %244 = dma.vmem_to_hbm [thread:$0]  %s239_s26, 256, %s534_s6, [#allocation12], %s421_s27, %s421_s27, %s422_s28   ;;  %v171_v34 = vpop.permute.xlu1 %170  ;;  %v169_v35 = vpop.permute.xlu0 %168 }
 0x171   :  { %175 = vst.msk [vmem:[#allocation10 + $0x8] sm:$0xff] %vm72_vm0, %v171_v34  ;;  %174 = vst.msk [vmem:[#allocation10] sm:$0xff] %vm72_vm0, %v169_v35  ;;  %s390_s7 = scalar_lea.vmem %s227_s10, 256  ;;  %p395_p12 = scmp.lt.s32.totalorder %s227_s10, %s227_s10 }
 0x172   :  { %p391_p11 = scmp.ne.s32.totalorder %s227_s10, %s390_s7  ;;  %p396_p13 = scmp.lt.s32.totalorder %s390_s7, %s390_s7 }
 0x174   :  { %p397_p0 = por %p396_p13, %p395_p12 }
 0x176   :  { %p398_p1 = pnand %p397_p0, %p391_p11 }
 0x178   :  { %401 = shalt.err (!%p398_p1)
}
 0x179   :  { %232 = dma.vmem_to_hbm [thread:$0]  %s227_s10, 256, %s533_s5, [#allocation9], %s421_s27, %s421_s27, %s422_s28  }
 0x17a   :  { %414 = dma.done.wait [#allocation4], 256  }
 0x17b   :  { %415 = vsyncadd [#allocation4], 4294967040 }
 0x17c   :  { %416 = dma.done.wait [#allocation9], 512  }
 0x17d   :  { %417 = vsyncadd [#allocation9], 4294966784 }
 0x17e   :  { %418 = dma.done.wait [#allocation12], 256  }
 0x17f   :  { %419 = vsyncadd [#allocation12], 4294967040 }
 0x180   :  { %261 = vsyncpa [#allocation3], 1 }
 0x181   :  { %262 = vsyncpa [#allocation6], 1 }
 0x182   :  { %263 = vsyncpa [#allocation4], 1 }
 0x183   :  { %264 = vsyncpa [#allocation9], 1 }
 0x184   :  { %265 = vsyncpa [#allocation12], 1 }

</bundles_post_ra>
